<compile_context>
chip_gen: v6e
topology: v6e:2x2x1
jax: 0.10.0
libtpu: 0.0.40
codegen_flags: <defaults>
</compile_context>

<pallas_src>
import functools

import jax
import jax.numpy as jnp
from jax.experimental import pallas as pl
from jax.experimental.pallas import tpu as pltpu

EPS = 1e-5

_ACTS = {
    "relu": lambda z: jnp.maximum(z, 0.0),
    "sigmoid": jax.nn.sigmoid,
    "tanh": jnp.tanh,
    "gelu": jax.nn.gelu,
    None: lambda z: z,
}


def _round_up(v, m):
    return ((v + m - 1) // m) * m


def _vmem_limit_bytes():
    # ~85% of per-core VMEM: headroom for compiler-internal scratch / pipeline buffers
    # (v7x: ~54 MiB of 64; v5e/v6e: ~108 MiB of 128).  Conservative fallback fits all gens.
    cap = 64 * 1024 * 1024
    try:
        info = pltpu.get_tpu_info()
        cap = int(getattr(info, "vmem_capacity_bytes", cap)) or cap
    except Exception:
        pass
    return int(cap * 0.85)


def _linear_bn_act_kernel(x_ref, wt_ref, gamma_ref, beta_ref, o_ref, acc_ref,
                          *, act_fn, inv_n):
    # x_ref: (N, tk), wt_ref: (tk, tn) -- already transposed in the wrapper,
    # gamma/beta: (1, tn), o_ref: (N, tn), acc_ref: (N, tn) f32 scratch.
    k = pl.program_id(1)

    @pl.when(k == 0)
    def _():
        acc_ref[...] = jnp.zeros_like(acc_ref)

    # Canonical (N, tk) x (tk, tn) matmul; f32 accumulation on the MXU.  The weight was
    # padded + transposed once in the wrapper, so no per-tile transpose is possible here.
    acc_ref[...] += jnp.dot(x_ref[...], wt_ref[...],
                            preferred_element_type=jnp.float32)

    @pl.when(k == pl.num_programs(1) - 1)
    def _():
        y = acc_ref[...]
        # BatchNorm1d (training mode): exact per-feature stats -- the full batch is
        # resident in this feature tile.  (Linear bias omitted: the batch-mean
        # subtraction below cancels any constant per-feature bias exactly.)
        mean = jnp.sum(y, axis=0, keepdims=True) * inv_n          # (1, tn)
        yc = y - mean
        var = jnp.sum(yc * yc, axis=0, keepdims=True) * inv_n     # biased variance
        # Fold BN + affine into one per-feature scale/shift (rsqrt -> EUP slot).
        s = gamma_ref[...] * jax.lax.rsqrt(var + EPS)              # (1, tn)
        t = beta_ref[...] - mean * s                               # (1, tn)
        o_ref[...] = act_fn(y * s + t).astype(o_ref.dtype)


def linear_bn_act(x, weight, bias, gamma, beta, *, act="relu",
                  feat_tile=None, k_tile=None, use_bf16_mxu=True,
                  out_dtype=jnp.float32):
    """Linear -> BatchNorm1d (train-mode batch stats) -> activation.

    x: (N, in_dim); weight: (out_dim, in_dim) (PyTorch layout); bias/gamma/beta: (out_dim,).
    Returns (N, out_dim) in `out_dtype`.

    `bias` is accepted for API fidelity but never used: train-mode BN subtracts the
    per-feature batch mean, so a constant per-feature bias cancels exactly (NOT true
    for eval-mode running stats).
    """
    if act not in _ACTS:
        raise ValueError(f"unsupported activation: {act!r}")
    n, in_dim = x.shape
    out_dim, in_dim_w = weight.shape
    assert in_dim_w == in_dim
    del bias  # cancelled exactly by the train-mode BN batch-mean subtraction

    # Feature (lane) axis padded to a multiple of 128 -> lane-dense, unmasked stores.
    m_pad = _round_up(out_dim, 128)

    # Contraction-dim tiling: keep K resident up to 2048, stream beyond that.
    if k_tile is None:
        k_ru = _round_up(in_dim, 128)
        k_tile = k_ru if k_ru <= 2048 else 2048
    assert k_tile % 128 == 0
    k_pad = _round_up(in_dim, k_tile)

    # Feature tile: multiple of 128 dividing m_pad, up to 1024, but guarantee >= 2 tiles
    # whenever m_pad >= 256 so v7x's two TensorCores both get work on the parallel axis.
    if feat_tile is None:
        cap = 1024
        if m_pad >= 256:
            cap = min(cap, m_pad // 2)
        feat_tile = max(t for t in range(128, cap + 128, 128) if m_pad % t == 0)
    assert feat_tile % 128 == 0 and m_pad % feat_tile == 0

    # Pad + transpose the weight once in the wrapper (fused by XLA with the pad); the
    # kernel then runs a canonical dot with no per-tile transpose.  Zero K-padding is
    # exact (contributes 0 to the contraction); padded feature columns are sliced off.
    w_t = jnp.pad(weight, ((0, m_pad - out_dim), (0, k_pad - in_dim))).T   # (k_pad, m_pad)
    x_p = jnp.pad(x, ((0, 0), (0, k_pad - in_dim)))                        # (n, k_pad)
    # Padded gamma columns use 1.0 (padded y is 0 -> finite outputs, sliced off below).
    g_p = jnp.pad(gamma.reshape(1, out_dim), ((0, 0), (0, m_pad - out_dim)),
                  constant_values=1.0)
    b_p = jnp.pad(beta.reshape(1, out_dim), ((0, 0), (0, m_pad - out_dim)))

    if use_bf16_mxu:
        # Halve x/weight HBM bytes (kernel is weight-bandwidth-bound); f32 accumulation
        # is preserved inside the kernel via the VMEM scratch.
        x_p = x_p.astype(jnp.bfloat16)
        w_t = w_t.astype(jnp.bfloat16)

    grid = (m_pad // feat_tile, k_pad // k_tile)   # reduction (K) axis last

    kernel = functools.partial(_linear_bn_act_kernel,
                               act_fn=_ACTS[act], inv_n=1.0 / n)

    out_p = pl.pallas_call(
        kernel,
        out_shape=jax.ShapeDtypeStruct((n, m_pad), out_dtype),
        grid_spec=pltpu.PrefetchScalarGridSpec(
            num_scalar_prefetch=0,
            grid=grid,
            in_specs=[
                # x: full batch, one K tile (re-DMA'd only when k changes).
                pl.BlockSpec((n, k_tile), lambda j, k: (0, k)),
                # W^T tile.
                pl.BlockSpec((k_tile, feat_tile), lambda j, k: (k, j)),
                # gamma/beta: block index constant across k -> copied once per feature tile.
                pl.BlockSpec((1, feat_tile), lambda j, k: (0, j)),
                pl.BlockSpec((1, feat_tile), lambda j, k: (0, j)),
            ],
            out_specs=pl.BlockSpec((n, feat_tile), lambda j, k: (0, j)),
            scratch_shapes=[pltpu.VMEM((n, feat_tile), jnp.float32)],
        ),
        compiler_params=pltpu.CompilerParams(
            # Feature tiles are independent (full batch resident per tile, exact
            # per-feature stats) -> shard across TCs; K is a reduction -> arbitrary.
            dimension_semantics=("parallel", "arbitrary"),
            vmem_limit_bytes=_vmem_limit_bytes(),
        ),
    )(x_p, w_t, g_p, b_p)

    return out_p[:, :out_dim]


def reference(x, weight, bias, gamma, beta, act="relu"):
    y = x @ weight.T + bias
    mean = y.mean(axis=0, keepdims=True)
    var = ((y - mean) ** 2).mean(axis=0, keepdims=True)
    y_hat = (y - mean) / jnp.sqrt(var + EPS)
    return _ACTS[act](gamma * y_hat + beta)


if __name__ == "__main__":
    key = jax.random.PRNGKey(0)

    # ---- Shape 1: module-consistent small shape (single K step, single feature tile).
    N, IN_DIM, OUT_DIM = 8, 32, 32
    kx, kw, kb = jax.random.split(key, 3)
    x = jax.random.normal(kx, (N, IN_DIM), dtype=jnp.float32)
    bound = 1.0 / (IN_DIM ** 0.5)  # nn.Linear default init
    weight = jax.random.uniform(kw, (OUT_DIM, IN_DIM), jnp.float32, -bound, bound)
    bias = jax.random.uniform(kb, (OUT_DIM,), jnp.float32, -bound, bound)
    gamma = jnp.ones((OUT_DIM,), jnp.float32)  # BatchNorm1d default affine
    beta = jnp.zeros((OUT_DIM,), jnp.float32)

    ref = reference(x, weight, bias, gamma, beta)

    # f32 MXU feed: strict check against the f32 reference.
    out_f32 = jax.block_until_ready(
        linear_bn_act(x, weight, bias, gamma, beta, use_bf16_mxu=False))
    assert out_f32.shape == (N, OUT_DIM)
    assert jnp.allclose(out_f32, ref, atol=1e-4, rtol=1e-4), "f32-feed mismatch"

    # Default bf16 MXU feed: intentional accuracy tradeoff -> looser tolerance.
    out_bf16 = jax.block_until_ready(linear_bn_act(x, weight, bias, gamma, beta))
    assert out_bf16.shape == (N, OUT_DIM)
    assert jnp.allclose(out_bf16, ref, atol=5e-2, rtol=5e-2), "bf16-feed mismatch"

    # ---- Shape 2: exercises multi-step K accumulation and >= 2 feature tiles.
    N2, IN2, OUT2 = 16, 200, 256
    k2x, k2w, k2b, k2g, k2beta = jax.random.split(jax.random.PRNGKey(1), 5)
    x2 = jax.random.normal(k2x, (N2, IN2), dtype=jnp.float32)
    bound2 = 1.0 / (IN2 ** 0.5)
    w2 = jax.random.uniform(k2w, (OUT2, IN2), jnp.float32, -bound2, bound2)
    b2 = jax.random.uniform(k2b, (OUT2,), jnp.float32, -bound2, bound2)
    g2 = 1.0 + 0.1 * jax.random.normal(k2g, (OUT2,), jnp.float32)
    be2 = 0.1 * jax.random.normal(k2beta, (OUT2,), jnp.float32)

    ref2 = reference(x2, w2, b2, g2, be2)
    out2 = jax.block_until_ready(
        linear_bn_act(x2, w2, b2, g2, be2, use_bf16_mxu=False, k_tile=128))
    assert out2.shape == (N2, OUT2)
    # Looser bound: absorbs XLA-vs-Mosaic f32-matmul precision-mode differences at K=200;
    # structural/tiling bugs would show up as O(1) errors, so this still gates correctness.
    assert jnp.allclose(out2, ref2, atol=2e-2, rtol=2e-2), "K-tiled path mismatch"

    print("KERNEL_OK")
</pallas_src>

<mosaic_0001>
module attributes {stable_mosaic.version = 11 : i64} {
  func.func @_linear_bn_act_kernel(%arg0: i32, %arg1: i32, %arg2: memref<8x128xf32, #tpu.memory_space<vmem>>, %arg3: memref<128x128xf32, #tpu.memory_space<vmem>>, %arg4: memref<1x128xf32, #tpu.memory_space<vmem>>, %arg5: memref<1x128xf32, #tpu.memory_space<vmem>>, %arg6: memref<8x128xf32, #tpu.memory_space<vmem>>, %arg7: memref<8x128xf32, #tpu.memory_space<vmem>>) attributes {dimension_semantics = [#tpu.dimension_semantics<parallel>, #tpu.dimension_semantics<arbitrary>], iteration_bounds = array<i64: 1, 1>, scalar_prefetch = 0 : i64, scratch_operands = 1 : i64, tpu.core_type = #tpu.core_type<tc>, window_params = [{transform_indices = @transform_0, window_bounds = array<i64: 8, 128>}, {transform_indices = @transform_1, window_bounds = array<i64: 128, 128>}, {transform_indices = @transform_2, window_bounds = array<i64: 1, 128>}, {transform_indices = @transform_3, window_bounds = array<i64: 1, 128>}, {transform_indices = @transform_4, window_bounds = array<i64: 8, 128>}]} {
    %c0_i32 = arith.constant 0 : i32
    %0 = arith.cmpi eq, %arg1, %c0_i32 : i32
    %1 = arith.extui %0 : i1 to i32
    %c0_i32_0 = arith.constant 0 : i32
    %2 = arith.cmpi ne, %1, %c0_i32_0 : i32
    scf.if %2 {
      %cst_10 = arith.constant 0.000000e+00 : f32
      %12 = vector.broadcast %cst_10 : f32 to vector<8x128xf32>
      %c0_11 = arith.constant 0 : index
      %c0_12 = arith.constant 0 : index
      %13 = vector.load %arg7[%c0_11, %c0_12] : memref<8x128xf32, #tpu.memory_space<vmem>>, vector<8x128xf32>
      tpu.vector_store %arg7[%c0_11, %c0_12], %12 {strides = array<i32>} : memref<8x128xf32, #tpu.memory_space<vmem>>, vector<8x128xf32>,
    } else {
    }
    %c0 = arith.constant 0 : index
    %c0_1 = arith.constant 0 : index
    %3 = vector.load %arg7[%c0, %c0_1] : memref<8x128xf32, #tpu.memory_space<vmem>>, vector<8x128xf32>
    %c0_2 = arith.constant 0 : index
    %c0_3 = arith.constant 0 : index
    %4 = vector.load %arg2[%c0_2, %c0_3] : memref<8x128xf32, #tpu.memory_space<vmem>>, vector<8x128xf32>
    %c0_4 = arith.constant 0 : index
    %c0_5 = arith.constant 0 : index
    %5 = vector.load %arg3[%c0_4, %c0_5] : memref<128x128xf32, #tpu.memory_space<vmem>>, vector<128x128xf32>
    %cst = arith.constant dense<0.000000e+00> : vector<8x128xf32>
    %6 = tpu.matmul %4, %5, %cst {dimension_numbers = #tpu.dot_dimension_numbers<[1], [0], [0], [1], [0, 0, 1, 1], [], []>} : vector<8x128xf32>, vector<128x128xf32>, vector<8x128xf32> -> vector<8x128xf32>
    %7 = arith.addf %3, %6 : vector<8x128xf32>
    %c0_6 = arith.constant 0 : index
    %c0_7 = arith.constant 0 : index
    %8 = vector.load %arg7[%c0_6, %c0_7] : memref<8x128xf32, #tpu.memory_space<vmem>>, vector<8x128xf32>
    tpu.vector_store %arg7[%c0_6, %c0_7], %7 {strides = array<i32>} : memref<8x128xf32, #tpu.memory_space<vmem>>, vector<8x128xf32>,
    %c0_i32_8 = arith.constant 0 : i32
    %9 = arith.cmpi eq, %arg1, %c0_i32_8 : i32
    %10 = arith.extui %9 : i1 to i32
    %c0_i32_9 = arith.constant 0 : i32
    %11 = arith.cmpi ne, %10, %c0_i32_9 : i32
    scf.if %11 {
      %c0_10 = arith.constant 0 : index
      %c0_11 = arith.constant 0 : index
      %12 = vector.load %arg7[%c0_10, %c0_11] : memref<8x128xf32, #tpu.memory_space<vmem>>, vector<8x128xf32>
      %cst_12 = arith.constant dense<0.000000e+00> : vector<128xf32>
      %13 = vector.multi_reduction <add>, %12, %cst_12 [0] : vector<8x128xf32> to vector<128xf32>
      %14 = vector.shape_cast %13 : vector<128xf32> to vector<1x128xf32>
      %cst_13 = arith.constant 1.250000e-01 : f32
      %15 = vector.broadcast %cst_13 : f32 to vector<1x128xf32>
      %16 = arith.mulf %14, %15 : vector<1x128xf32>
      %17 = vector.broadcast %16 : vector<1x128xf32> to vector<8x128xf32>
      %18 = arith.subf %12, %17 : vector<8x128xf32>
      %19 = arith.mulf %18, %18 : vector<8x128xf32>
      %cst_14 = arith.constant dense<0.000000e+00> : vector<128xf32>
      %20 = vector.multi_reduction <add>, %19, %cst_14 [0] : vector<8x128xf32> to vector<128xf32>
      %21 = vector.shape_cast %20 : vector<128xf32> to vector<1x128xf32>
      %cst_15 = arith.constant 1.250000e-01 : f32
      %22 = vector.broadcast %cst_15 : f32 to vector<1x128xf32>
      %23 = arith.mulf %21, %22 : vector<1x128xf32>
      %c0_16 = arith.constant 0 : index
      %c0_17 = arith.constant 0 : index
      %24 = vector.load %arg4[%c0_16, %c0_17] : memref<1x128xf32, #tpu.memory_space<vmem>>, vector<1x128xf32>
      %cst_18 = arith.constant 9.99999974E-6 : f32
      %25 = vector.broadcast %cst_18 : f32 to vector<1x128xf32>
      %26 = arith.addf %23, %25 : vector<1x128xf32>
      %27 = math.rsqrt %26 : vector<1x128xf32>
      %28 = arith.mulf %24, %27 : vector<1x128xf32>
      %c0_19 = arith.constant 0 : index
      %c0_20 = arith.constant 0 : index
      %29 = vector.load %arg5[%c0_19, %c0_20] : memref<1x128xf32, #tpu.memory_space<vmem>>, vector<1x128xf32>
      %30 = arith.mulf %16, %28 : vector<1x128xf32>
      %31 = arith.subf %29, %30 : vector<1x128xf32>
      %32 = vector.broadcast %28 : vector<1x128xf32> to vector<8x128xf32>
      %33 = arith.mulf %12, %32 : vector<8x128xf32>
      %34 = vector.broadcast %31 : vector<1x128xf32> to vector<8x128xf32>
      %35 = arith.addf %33, %34 : vector<8x128xf32>
      %cst_21 = arith.constant 0.000000e+00 : f32
      %36 = vector.broadcast %cst_21 : f32 to vector<8x128xf32>
      %37 = arith.maximumf %35, %36 : vector<8x128xf32>
      %c0_22 = arith.constant 0 : index
      %c0_23 = arith.constant 0 : index
      %38 = vector.load %arg6[%c0_22, %c0_23] : memref<8x128xf32, #tpu.memory_space<vmem>>, vector<8x128xf32>
      tpu.vector_store %arg6[%c0_22, %c0_23], %37 {strides = array<i32>} : memref<8x128xf32, #tpu.memory_space<vmem>>, vector<8x128xf32>,
    } else {
    }
    return
  }
  func.func @transform_0(%arg0: i32, %arg1: i32) -> (i32, i32) {
    %c0_i32 = arith.constant 0 : i32
    %c0_i32_0 = arith.constant 0 : i32
    return %c0_i32, %arg1 : i32, i32
  }
  func.func @transform_1(%arg0: i32, %arg1: i32) -> (i32, i32) {
    %c0_i32 = arith.constant 0 : i32
    return %arg1, %arg0 : i32, i32
  }
  func.func @transform_2(%arg0: i32, %arg1: i32) -> (i32, i32) {
    %c0_i32 = arith.constant 0 : i32
    %c0_i32_0 = arith.constant 0 : i32
    return %c0_i32, %arg0 : i32, i32
  }
  func.func @transform_3(%arg0: i32, %arg1: i32) -> (i32, i32) {
    %c0_i32 = arith.constant 0 : i32
    %c0_i32_0 = arith.constant 0 : i32
    return %c0_i32, %arg0 : i32, i32
  }
  func.func @transform_4(%arg0: i32, %arg1: i32) -> (i32, i32) {
    %c0_i32 = arith.constant 0 : i32
    %c0_i32_0 = arith.constant 0 : i32
    return %c0_i32, %arg0 : i32, i32
  }
}

</mosaic_0001>

<bundles_post_ra>
// kernel: tpu_custom_call.1
= control target key start
LH: loop header
LB: loop body
LE: loop exit
PB: predicated region body
PF: predicated region fallthrough
CT: control target
= control target key end

     0   :  { %9 = vsyncpa [#allocation4], 0  ;;  %s372_s0 = inlined_call_operand.hbm [shape: f32[8,128], index: 0, kind: input, shape index: {}]   ;;  %s373_s1 = inlined_call_operand.hbm [shape: f32[128,128], index: 1, kind: input, shape index: {}]   ;;  %s374_s2 = inlined_call_operand.vmem [shape: f32[1,128], index: 2, kind: input, shape index: {}]   ;;  %s375_s3 = inlined_call_operand.vmem [shape: f32[1,128], index: 3, kind: input, shape index: {}]   ;;  %s376_s4 = inlined_call_operand.hbm [shape: f32[8,128], index: 4, kind: output, shape index: {}]  }
   0x1   :  { %10 = vsyncpa [#allocation7], 0 }
   0x2   :  { %11 = vsyncpa [#allocation5], 0  ;;  %s325_s15 = smov [#allocation3]   ;;  %s326_s17 = smov [#allocation6]  }
   0x3   :  { %s18_s16 = sshll.u32 %s325_s15, 4  ;;  %s27_s18 = sshll.u32 %s326_s17, 4  ;;  %s19_s16 = int_to_ptr.vmem [resolvable:$true] %s18_s16  ;;  %s28_s18 = int_to_ptr.vmem [resolvable:$true] %s27_s18 }
   0x4   :  { %s267_s19 = scalar_lea.vmem %s19_s16, 128  ;;  %p272_p1 = scmp.lt.s32.totalorder %s19_s16, %s19_s16 }
   0x5   :  { %p268_p0 = scmp.ne.s32.totalorder %s19_s16, %s267_s19  ;;  %p273_p2 = scmp.lt.s32.totalorder %s267_s19, %s267_s19 }
   0x7   :  { %p274_p3 = por %p273_p2, %p272_p1 }
   0x9   :  { %p275_p4 = pnand %p274_p3, %p268_p0 }
   0xb   :  { %278 = shalt.err (!%p275_p4)
}
   0xc   :  { %21 = dma.hbm_to_vmem [thread:$0]  %s372_s0, 128, %s19_s16, [#allocation4]  }
   0xd   :  { %s287_s22 = scalar_lea.vmem %s28_s18, 2048  ;;  %p292_p6 = scmp.lt.s32.totalorder %s28_s18, %s28_s18 }
   0xe   :  { %p288_p5 = scmp.ne.s32.totalorder %s28_s18, %s287_s22  ;;  %p293_p7 = scmp.lt.s32.totalorder %s287_s22, %s287_s22 }
  0x10   :  { %p294_p8 = por %p293_p7, %p292_p6 }
  0x12   :  { %p295_p9 = pnand %p294_p8, %p288_p5 }
  0x14   :  { %298 = shalt.err (!%p295_p9)
}
  0x15   :  { %s327_s23 = smov 128   ;;  %s328_s24 = smov 8  }
  0x16   :  { %33 = dma.hbm_to_vmem [thread:$0]  %s373_s1, 2048, %s28_s18, [#allocation7], %s327_s23, %s327_s23, %s328_s24  }
  0x17   :  { %319 = dma.done.wait [#allocation4], 128  }
  0x18   :  { %320 = vsyncadd [#allocation4], 4294967168 }
  0x19   :  { %321 = dma.done.wait [#allocation7], 2048  }
  0x1a   :  { %322 = vsyncadd [#allocation7], 4294965248  ;;  %v329_v0 = vmov 0.0   ;;  %vm330_vm0 = vmmov 0   ;;  %v66_v1 = vld [vmem:[#allocation6 + $0x78] sm:$0xff]  ;;  %v65_v2 = vld [vmem:[#allocation6 + $0x70] sm:$0xff]  ;;  %v167_v37 = vlaneseq }
  0x1b   :  { %215 = vmatprep.subr.mxu0 %v329_v0  ;;  %247 = vmatprep.mubr.msk.f32.mxu0 %vm330_vm0, %v329_v0  ;;  %v64_v3 = vld [vmem:[#allocation6 + $0x68] sm:$0xff]  ;;  %v63_v4 = vld [vmem:[#allocation6 + $0x60] sm:$0xff]  ;;  %v62_v5 = vld [vmem:[#allocation6 + $0x58] sm:$0xff]  ;;  %s331_s29 = smov [#allocation8]  }
  0x1c   :  { %216 = vmatpush3.msra.mxu0 %v66_v1  ;;  %v61_v6 = vld [vmem:[#allocation6 + $0x50] sm:$0xff]  ;;  %v60_v7 = vld [vmem:[#allocation6 + $0x48] sm:$0xff]  ;;  %v59_v8 = vld [vmem:[#allocation6 + $0x40] sm:$0xff]  ;;  %v168_v38 = vshrl.u32 %v167_v37, 7  ;;  %s188_s30 = sshll.u32 %s331_s29, 4  ;;  %s189_s30 = int_to_ptr.vmem [resolvable:$true] %s188_s30 }
  0x1d   :  { %217 = vmatprep.subr.mxu0 %v329_v0  ;;  %v58_v9 = vld [vmem:[#allocation6 + $0x38] sm:$0xff]  ;;  %v57_v10 = vld [vmem:[#allocation6 + $0x30] sm:$0xff]  ;;  %v56_v11 = vld [vmem:[#allocation6 + $0x28] sm:$0xff]  ;;  %s299_s5 = scalar_lea.vmem %s189_s30, 128  ;;  %p304_p11 = scmp.lt.s32.totalorder %s189_s30, %s189_s30 }
  0x1e   :  { %218 = vmatpush3.msra.mxu0 %v65_v2  ;;  %v55_v12 = vld [vmem:[#allocation6 + $0x20] sm:$0xff]  ;;  %v54_v13 = vld [vmem:[#allocation6 + $0x18] sm:$0xff]  ;;  %v53_v14 = vld [vmem:[#allocation6 + $0x10] sm:$0xff]  ;;  %v169_v40 = vsub.s32 0, %v168_v38  ;;  %p300_p10 = scmp.ne.s32.totalorder %s189_s30, %s299_s5  ;;  %p305_p12 = scmp.lt.s32.totalorder %s299_s5, %s299_s5 }
  0x1f   :  { %219 = vmatprep.subr.mxu0 %v329_v0  ;;  %v52_v15 = vld [vmem:[#allocation6 + $0x8] sm:$0xff]  ;;  %v51_v16 = vld [vmem:[#allocation6] sm:$0xff]  ;;  %v50_v17 = vld [vmem:[#allocation3] sm:$0xff] }
  0x20   :  { %220 = vmatpush3.msra.mxu0 %v64_v3  ;;  %v159_v39 = vld [vmem:[%s374_s2] sm:$0x1]  ;;  %p306_p13 = por %p305_p12, %p304_p11 }
  0x21   :  { %221 = vmatprep.subr.mxu0 %v329_v0  ;;  %v163_v43 = vld [vmem:[%s375_s3] sm:$0x1] }
  0x22   :  { %222 = vmatpush3.msra.mxu0 %v63_v4  ;;  %p307_p0 = pnand %p306_p13, %p300_p10 }
  0x23   :  { %223 = vmatprep.subr.mxu0 %v329_v0 }
  0x24   :  { %224 = vmatpush3.msra.mxu0 %v62_v5 }
  0x25   :  { %225 = vmatprep.subr.mxu0 %v329_v0 }
  0x26   :  { %226 = vmatpush3.msra.mxu0 %v61_v6 }
  0x27   :  { %227 = vmatprep.subr.mxu0 %v329_v0 }
  0x28   :  { %228 = vmatpush3.msra.mxu0 %v60_v7 }
  0x29   :  { %229 = vmatprep.subr.mxu0 %v329_v0 }
  0x2a   :  { %230 = vmatpush3.msra.mxu0 %v59_v8 }
  0x2b   :  { %231 = vmatprep.subr.mxu0 %v329_v0 }
  0x2c   :  { %232 = vmatpush3.msra.mxu0 %v58_v9 }
  0x2d   :  { %233 = vmatprep.subr.mxu0 %v329_v0 }
  0x2e   :  { %234 = vmatpush3.msra.mxu0 %v57_v10 }
  0x2f   :  { %235 = vmatprep.subr.mxu0 %v329_v0 }
  0x30   :  { %236 = vmatpush3.msra.mxu0 %v56_v11 }
  0x31   :  { %237 = vmatprep.subr.mxu0 %v329_v0 }
  0x32   :  { %238 = vmatpush3.msra.mxu0 %v55_v12 }
  0x33   :  { %239 = vmatprep.subr.mxu0 %v329_v0 }
  0x34   :  { %240 = vmatpush3.msra.mxu0 %v54_v13 }
  0x35   :  { %241 = vmatprep.subr.mxu0 %v329_v0 }
  0x36   :  { %242 = vmatpush3.msra.mxu0 %v53_v14 }
  0x37   :  { %243 = vmatprep.subr.mxu0 %v329_v0 }
  0x38   :  { %244 = vmatpush3.msra.mxu0 %v52_v15 }
  0x39   :  { %245 = vmatprep.subr.mxu0 %v329_v0 }
  0x3a   :  { %246 = vmatpush3.msra.mxu0 %v51_v16 }
  0x3b   :  { %248 = vmatmul.mubr.f32.vlgmr.msra.gmra.mxu0 %v50_v17 }
  0xfb   :  { %v133_v18 = vpop.f32.mrf.mxu0 }
  0xfc   :  { %v143_v19 = vrot.slane %v133_v18, 4 }
  0xfd   :  { %v249_v20 = vpop.f32.mrf.mxu0 }
  0xfe   :  { %v144_v21 = vadd.f32 %v143_v19, %v133_v18 }
 0x100   :  { %v145_v22 = vrot.slane %v144_v21, 2 }
 0x102   :  { %v146_v23 = vadd.f32 %v145_v22, %v144_v21 }
 0x104   :  { %v147_v24 = vrot.slane %v146_v23, 1 }
 0x106   :  { %v148_v25 = vadd.f32 %v147_v24, %v146_v23 }
 0x108   :  { %v149_v26 = vmul.f32 0.125, %v148_v25 }
 0x10a   :  { %v150_v27 = vsub.f32 %v133_v18, %v149_v26 }
 0x10c   :  { %v151_v28 = vmul.f32 %v150_v27, %v150_v27 }
 0x10e   :  { %v152_v29 = vrot.slane %v151_v28, 4 }
 0x110   :  { %v153_v30 = vadd.f32 %v152_v29, %v151_v28 }
 0x112   :  { %v154_v31 = vrot.slane %v153_v30, 2 }
 0x114   :  { %v155_v32 = vadd.f32 %v154_v31, %v153_v30 }
 0x116   :  { %v156_v33 = vrot.slane %v155_v32, 1 }
 0x118   :  { %v157_v34 = vadd.f32 %v156_v33, %v155_v32 }
 0x11a   :  { %v158_v35 = vmul.f32 0.125, %v157_v34 }
 0x11c   :  { %v160_v36 = vadd.f32 1e-05, %v158_v35 }
 0x11e   :  { %257 = vrsqrt.f32 %v160_v36 }
 0x12b   :  { %v258_v41 = vpop.eup %257 }
 0x12c   :  { %v162_v42 = vmul.f32 %v258_v41, %v159_v39 }
 0x12e   :  { %v164_v44 = vmul.f32 %v162_v42, %v149_v26  ;;  %v170_v45 = vrot.slane %v162_v42, %v169_v40 }
 0x130   :  { %v165_v46 = vsub.f32 %v163_v43, %v164_v44  ;;  %v172_v47 = vmul.f32 %v170_v45, %v133_v18 }
 0x132   :  { %v177_v48 = vrot.slane %v165_v46, %v169_v40 }
 0x134   :  { %v179_v49 = vadd.f32 %v177_v48, %v172_v47 }
 0x136   :  { %v180_v50 = vmax.f32 %v179_v49, 0.0 }
 0x138   :  { %181 = vst [vmem:[#allocation8] sm:$0xff] %v180_v50 }
 0x139   :  { %310 = shalt.err (!%p307_p0)
}
 0x13a   :  { %191 = dma.vmem_to_hbm [thread:$0]  %s189_s30, 128, %s376_s4, [#allocation5]  }
 0x13b   :  { %323 = dma.done.wait [#allocation5], 128  }
 0x13c   :  { %324 = vsyncadd [#allocation5], 4294967168 }
 0x13d   :  { %195 = vsyncpa [#allocation4], 1 }
 0x13e   :  { %196 = vsyncpa [#allocation7], 1 }
 0x13f   :  { %197 = vsyncpa [#allocation5], 1 }

</bundles_post_ra>
